<compile_context>
chip_gen: v7x
topology: tpu7x:2x2x1
jax: 0.10.0
libtpu: 0.0.40
codegen_flags: <defaults>
</compile_context>

<pallas_src>
import jax
import jax.numpy as jnp
from jax.experimental import pallas as pl
from jax.experimental.pallas import tpu as pltpu

INPUT_SIZE = 4
HIDDEN_SIZE = 4
OUTPUT_SIZE = 3
BN_EPS = 1e-5
LANES = 128     # packed-weight minor axis: one full lane width, unmasked compute
W_ROWS = 16     # two 8-sublane tiles: fc1 block (rows 0-7), fc2 block (rows 8-15)


def net_kernel(x_ref, w_ref, o_ref):
    """Single-block kernel; the whole problem fits in a handful of vregs.

    x_ref : (B, INPUT_SIZE)  f32 raw input features
    w_ref : (W_ROWS, 128)    f32 packed, BN-affine-folded parameters:
                               rows 0:4  = w1f (lanes >= HIDDEN zero)
                               row  4    = b1f
                               rows 8:12 = w2  (lanes >= OUTPUT zero)
                               row  12   = b2
    o_ref : (B, OUTPUT_SIZE) f32 logits
    """
    x = x_ref[...]
    B = x.shape[0]
    inv_b = 1.0 / B

    # --- BatchNorm1d (training mode: batch stats, biased variance) ----------
    # Single pass: sum and sum-of-squares are two *independent* cross-sublane
    # reductions (no second reduce over centered data).
    s = jnp.sum(x, axis=0, keepdims=True)             # (1, INPUT)
    ss = jnp.sum(x * x, axis=0, keepdims=True)        # (1, INPUT)
    mean = s * inv_b
    var = jnp.maximum(ss * inv_b - mean * mean, 0.0)  # biased variance, clamped
    x_hat = (x - mean) * jax.lax.rsqrt(var + BN_EPS)  # (B, INPUT); rsqrt -> EUP

    w = w_ref[...]                                    # (16, 128), 2 vregs

    # --- fc1 (BN affine pre-folded) + ReLU ----------------------------------
    # Two independent MAC chains (even/odd k) so the lane-broadcast -> vmul ->
    # vadd latency of the 4 terms overlaps; bias seeds chain 0, ReLU fused
    # into the final join add.
    acc0 = jnp.broadcast_to(w[4:5, :], (B, LANES)) + x_hat[:, 0:1] * w[0:1, :]
    acc1 = x_hat[:, 1:2] * w[1:2, :]
    acc0 = acc0 + x_hat[:, 2:3] * w[2:3, :]
    acc1 = acc1 + x_hat[:, 3:4] * w[3:4, :]
    h = jnp.maximum(acc0 + acc1, 0.0)                 # (B, 128), lanes >= HIDDEN are 0

    # --- fc2: same two-chain unrolled VPU MAC --------------------------------
    acc0 = jnp.broadcast_to(w[12:13, :], (B, LANES)) + h[:, 0:1] * w[8:9, :]
    acc1 = h[:, 1:2] * w[9:10, :]
    acc0 = acc0 + h[:, 2:3] * w[10:11, :]
    acc1 = acc1 + h[:, 3:4] * w[11:12, :]
    out = acc0 + acc1                                 # (B, 128), lanes >= OUTPUT are 0

    o_ref[...] = out[:, :OUTPUT_SIZE]                 # single masked (B, 3) store


def pack_params(gamma, beta, w1, b1, w2, b2):
    """One-time host-side prep: fold the BatchNorm affine into fc1 and pack
    all weights/biases into a single lane-padded (16, 128) f32 buffer.

      (gamma*x_hat + beta) @ W1 + b1 == x_hat @ (diag(gamma) @ W1) + (beta @ W1 + b1)
    """
    w1f = gamma.reshape(-1, 1) * w1                   # (4, 4) row-scaled
    b1f = (beta @ w1 + b1).reshape(-1)                # (4,)
    packed = jnp.zeros((W_ROWS, LANES), jnp.float32)
    packed = packed.at[0:INPUT_SIZE, :HIDDEN_SIZE].set(w1f)
    packed = packed.at[INPUT_SIZE, :HIDDEN_SIZE].set(b1f)
    packed = packed.at[8:8 + HIDDEN_SIZE, :OUTPUT_SIZE].set(w2)
    packed = packed.at[8 + HIDDEN_SIZE, :OUTPUT_SIZE].set(b2.reshape(-1))
    return packed


@jax.jit
def net_forward(x, packed_w):
    """Per-call path: exactly one pallas_call, two operands, no wrapper ops."""
    B = x.shape[0]
    return pl.pallas_call(
        net_kernel,
        out_shape=jax.ShapeDtypeStruct((B, OUTPUT_SIZE), jnp.float32),
        in_specs=[pl.BlockSpec(memory_space=pltpu.MemorySpace.VMEM),
                  pl.BlockSpec(memory_space=pltpu.MemorySpace.VMEM)],
        out_specs=pl.BlockSpec(memory_space=pltpu.MemorySpace.VMEM),
    )(x, packed_w)


def init_params(key):
    """Deterministic init mimicking nn.Linear defaults (U[-1/sqrt(fan_in), +])."""
    k1, k2, k3, k4, k5, k6 = jax.random.split(key, 6)
    bound1 = 1.0 / jnp.sqrt(INPUT_SIZE)
    bound2 = 1.0 / jnp.sqrt(HIDDEN_SIZE)
    # Stored as (in, out): equivalent to torch Linear weight (out, in) transposed.
    w1 = jax.random.uniform(k1, (INPUT_SIZE, HIDDEN_SIZE), jnp.float32, -bound1, bound1)
    b1 = jax.random.uniform(k2, (1, HIDDEN_SIZE), jnp.float32, -bound1, bound1)
    w2 = jax.random.uniform(k3, (HIDDEN_SIZE, OUTPUT_SIZE), jnp.float32, -bound2, bound2)
    b2 = jax.random.uniform(k4, (1, OUTPUT_SIZE), jnp.float32, -bound2, bound2)
    # BatchNorm affine params. PyTorch default init is weight=1 / bias=0; they are
    # randomized here so the affine-fold-into-fc1 path is actually exercised.
    gamma = jax.random.uniform(k5, (1, INPUT_SIZE), jnp.float32, 0.5, 1.5)
    beta = 0.1 * jax.random.normal(k6, (1, INPUT_SIZE), jnp.float32)
    return gamma, beta, w1, b1, w2, b2


def reference_forward(x, gamma, beta, w1, b1, w2, b2):
    """Pure-JAX reference (two-pass BN, un-folded affine) for a sanity check."""
    mean = jnp.mean(x, axis=0, keepdims=True)
    var = jnp.mean((x - mean) ** 2, axis=0, keepdims=True)  # biased, like PyTorch fwd
    xb = (x - mean) / jnp.sqrt(var + BN_EPS) * gamma + beta
    h = jnp.maximum(xb @ w1 + b1, 0.0)
    return h @ w2 + b2


# TODO(synk): BatchNorm1d running_mean/running_var updates (training-mode side
# effect) are not implemented; only the forward output is produced.

if __name__ == "__main__":
    key = jax.random.PRNGKey(0)
    kx, kp = jax.random.split(key)

    batch = 8
    x = jax.random.normal(kx, (batch, INPUT_SIZE), jnp.float32)
    gamma, beta, w1, b1, w2, b2 = init_params(kp)

    # One-time weight prep (fold + pack); reused across every forward call.
    packed_w = jax.block_until_ready(pack_params(gamma, beta, w1, b1, w2, b2))

    out = jax.block_until_ready(net_forward(x, packed_w))
    ref = reference_forward(x, gamma, beta, w1, b1, w2, b2)

    assert out.shape == (batch, OUTPUT_SIZE)
    assert jnp.allclose(out, ref, atol=1e-4, rtol=1e-4), "mismatch vs reference"

    print("KERNEL_OK")
</pallas_src>

<mosaic_0001>
module attributes {stable_mosaic.version = 11 : i64} {
  func.func @net_kernel(%arg0: memref<8x4xf32, #tpu.memory_space<vmem>>, %arg1: memref<16x128xf32, #tpu.memory_space<vmem>>, %arg2: memref<8x3xf32, #tpu.memory_space<vmem>>) attributes {dimension_semantics = [], scalar_prefetch = 0 : i64, scratch_operands = 0 : i64, tpu.core_type = #tpu.core_type<tc>} {
    %c0 = arith.constant 0 : index
    %c0_0 = arith.constant 0 : index
    %0 = vector.load %arg0[%c0, %c0_0] : memref<8x4xf32, #tpu.memory_space<vmem>>, vector<8x4xf32>
    %cst = arith.constant dense<0.000000e+00> : vector<4xf32>
    %1 = vector.multi_reduction <add>, %0, %cst [0] : vector<8x4xf32> to vector<4xf32>
    %2 = vector.shape_cast %1 : vector<4xf32> to vector<1x4xf32>
    %3 = arith.mulf %0, %0 : vector<8x4xf32>
    %cst_1 = arith.constant dense<0.000000e+00> : vector<4xf32>
    %4 = vector.multi_reduction <add>, %3, %cst_1 [0] : vector<8x4xf32> to vector<4xf32>
    %5 = vector.shape_cast %4 : vector<4xf32> to vector<1x4xf32>
    %cst_2 = arith.constant 1.250000e-01 : f32
    %6 = vector.broadcast %cst_2 : f32 to vector<1x4xf32>
    %7 = arith.mulf %2, %6 : vector<1x4xf32>
    %cst_3 = arith.constant 1.250000e-01 : f32
    %8 = vector.broadcast %cst_3 : f32 to vector<1x4xf32>
    %9 = arith.mulf %5, %8 : vector<1x4xf32>
    %10 = arith.mulf %7, %7 : vector<1x4xf32>
    %11 = arith.subf %9, %10 : vector<1x4xf32>
    %cst_4 = arith.constant 0.000000e+00 : f32
    %12 = vector.broadcast %cst_4 : f32 to vector<1x4xf32>
    %13 = arith.maximumf %11, %12 : vector<1x4xf32>
    %14 = vector.broadcast %7 : vector<1x4xf32> to vector<8x4xf32>
    %15 = arith.subf %0, %14 : vector<8x4xf32>
    %cst_5 = arith.constant 9.99999974E-6 : f32
    %16 = vector.broadcast %cst_5 : f32 to vector<1x4xf32>
    %17 = arith.addf %13, %16 : vector<1x4xf32>
    %18 = math.rsqrt %17 : vector<1x4xf32>
    %19 = vector.broadcast %18 : vector<1x4xf32> to vector<8x4xf32>
    %20 = arith.mulf %15, %19 : vector<8x4xf32>
    %c0_6 = arith.constant 0 : index
    %c0_7 = arith.constant 0 : index
    %21 = vector.load %arg1[%c0_6, %c0_7] : memref<16x128xf32, #tpu.memory_space<vmem>>, vector<16x128xf32>
    %22 = vector.extract_strided_slice %21 {offsets = [4, 0], sizes = [1, 128], strides = [1, 1]} : vector<16x128xf32> to vector<1x128xf32>
    %23 = vector.shape_cast %22 : vector<1x128xf32> to vector<1x128xf32>
    %24 = vector.broadcast %23 : vector<1x128xf32> to vector<8x128xf32>
    %25 = vector.extract_strided_slice %20 {offsets = [0, 0], sizes = [8, 1], strides = [1, 1]} : vector<8x4xf32> to vector<8x1xf32>
    %26 = vector.extract_strided_slice %21 {offsets = [0, 0], sizes = [1, 128], strides = [1, 1]} : vector<16x128xf32> to vector<1x128xf32>
    %27 = vector.broadcast %25 : vector<8x1xf32> to vector<8x128xf32>
    %28 = vector.broadcast %26 : vector<1x128xf32> to vector<8x128xf32>
    %29 = arith.mulf %27, %28 : vector<8x128xf32>
    %30 = arith.addf %24, %29 : vector<8x128xf32>
    %31 = vector.extract_strided_slice %20 {offsets = [0, 1], sizes = [8, 1], strides = [1, 1]} : vector<8x4xf32> to vector<8x1xf32>
    %32 = vector.extract_strided_slice %21 {offsets = [1, 0], sizes = [1, 128], strides = [1, 1]} : vector<16x128xf32> to vector<1x128xf32>
    %33 = vector.broadcast %31 : vector<8x1xf32> to vector<8x128xf32>
    %34 = vector.broadcast %32 : vector<1x128xf32> to vector<8x128xf32>
    %35 = arith.mulf %33, %34 : vector<8x128xf32>
    %36 = vector.extract_strided_slice %20 {offsets = [0, 2], sizes = [8, 1], strides = [1, 1]} : vector<8x4xf32> to vector<8x1xf32>
    %37 = vector.extract_strided_slice %21 {offsets = [2, 0], sizes = [1, 128], strides = [1, 1]} : vector<16x128xf32> to vector<1x128xf32>
    %38 = vector.broadcast %36 : vector<8x1xf32> to vector<8x128xf32>
    %39 = vector.broadcast %37 : vector<1x128xf32> to vector<8x128xf32>
    %40 = arith.mulf %38, %39 : vector<8x128xf32>
    %41 = arith.addf %30, %40 : vector<8x128xf32>
    %42 = vector.extract_strided_slice %20 {offsets = [0, 3], sizes = [8, 1], strides = [1, 1]} : vector<8x4xf32> to vector<8x1xf32>
    %43 = vector.extract_strided_slice %21 {offsets = [3, 0], sizes = [1, 128], strides = [1, 1]} : vector<16x128xf32> to vector<1x128xf32>
    %44 = vector.broadcast %42 : vector<8x1xf32> to vector<8x128xf32>
    %45 = vector.broadcast %43 : vector<1x128xf32> to vector<8x128xf32>
    %46 = arith.mulf %44, %45 : vector<8x128xf32>
    %47 = arith.addf %35, %46 : vector<8x128xf32>
    %48 = arith.addf %41, %47 : vector<8x128xf32>
    %cst_8 = arith.constant 0.000000e+00 : f32
    %49 = vector.broadcast %cst_8 : f32 to vector<8x128xf32>
    %50 = arith.maximumf %48, %49 : vector<8x128xf32>
    %51 = vector.extract_strided_slice %21 {offsets = [12, 0], sizes = [1, 128], strides = [1, 1]} : vector<16x128xf32> to vector<1x128xf32>
    %52 = vector.shape_cast %51 : vector<1x128xf32> to vector<1x128xf32>
    %53 = vector.broadcast %52 : vector<1x128xf32> to vector<8x128xf32>
    %54 = vector.extract_strided_slice %50 {offsets = [0, 0], sizes = [8, 1], strides = [1, 1]} : vector<8x128xf32> to vector<8x1xf32>
    %55 = vector.extract_strided_slice %21 {offsets = [8, 0], sizes = [1, 128], strides = [1, 1]} : vector<16x128xf32> to vector<1x128xf32>
    %56 = vector.broadcast %54 : vector<8x1xf32> to vector<8x128xf32>
    %57 = vector.broadcast %55 : vector<1x128xf32> to vector<8x128xf32>
    %58 = arith.mulf %56, %57 : vector<8x128xf32>
    %59 = arith.addf %53, %58 : vector<8x128xf32>
    %60 = vector.extract_strided_slice %50 {offsets = [0, 1], sizes = [8, 1], strides = [1, 1]} : vector<8x128xf32> to vector<8x1xf32>
    %61 = vector.extract_strided_slice %21 {offsets = [9, 0], sizes = [1, 128], strides = [1, 1]} : vector<16x128xf32> to vector<1x128xf32>
    %62 = vector.broadcast %60 : vector<8x1xf32> to vector<8x128xf32>
    %63 = vector.broadcast %61 : vector<1x128xf32> to vector<8x128xf32>
    %64 = arith.mulf %62, %63 : vector<8x128xf32>
    %65 = vector.extract_strided_slice %50 {offsets = [0, 2], sizes = [8, 1], strides = [1, 1]} : vector<8x128xf32> to vector<8x1xf32>
    %66 = vector.extract_strided_slice %21 {offsets = [10, 0], sizes = [1, 128], strides = [1, 1]} : vector<16x128xf32> to vector<1x128xf32>
    %67 = vector.broadcast %65 : vector<8x1xf32> to vector<8x128xf32>
    %68 = vector.broadcast %66 : vector<1x128xf32> to vector<8x128xf32>
    %69 = arith.mulf %67, %68 : vector<8x128xf32>
    %70 = arith.addf %59, %69 : vector<8x128xf32>
    %71 = vector.extract_strided_slice %50 {offsets = [0, 3], sizes = [8, 1], strides = [1, 1]} : vector<8x128xf32> to vector<8x1xf32>
    %72 = vector.extract_strided_slice %21 {offsets = [11, 0], sizes = [1, 128], strides = [1, 1]} : vector<16x128xf32> to vector<1x128xf32>
    %73 = vector.broadcast %71 : vector<8x1xf32> to vector<8x128xf32>
    %74 = vector.broadcast %72 : vector<1x128xf32> to vector<8x128xf32>
    %75 = arith.mulf %73, %74 : vector<8x128xf32>
    %76 = arith.addf %64, %75 : vector<8x128xf32>
    %77 = arith.addf %70, %76 : vector<8x128xf32>
    %78 = vector.extract_strided_slice %77 {offsets = [0, 0], sizes = [8, 3], strides = [1, 1]} : vector<8x128xf32> to vector<8x3xf32>
    %c0_9 = arith.constant 0 : index
    %c0_10 = arith.constant 0 : index
    %79 = vector.load %arg2[%c0_9, %c0_10] : memref<8x3xf32, #tpu.memory_space<vmem>>, vector<8x3xf32>
    tpu.vector_store %arg2[%c0_9, %c0_10], %78 {strides = array<i32>} : memref<8x3xf32, #tpu.memory_space<vmem>>, vector<8x3xf32>,
    return
  }
}

</mosaic_0001>

<bundles_post_ra>
// kernel: net_forward.1
= control target key start
LH: loop header
LB: loop body
LE: loop exit
PB: predicated region body
PF: predicated region fallthrough
CT: control target
= control target key end

     0   :  { %7 = vsyncpa [#allocation3], 0  ;;  %s191_s9 = smov [#allocation2]   ;;  %s233_s0 = inlined_call_operand.vmem [shape: f32[8,4], index: 0, kind: input, shape index: {}]   ;;  %s234_s1 = inlined_call_operand.hbm [shape: f32[16,128], index: 1, kind: input, shape index: {}]   ;;  %s235_s2 = inlined_call_operand.vmem [shape: f32[8,3], index: 2, kind: output, shape index: {}]  }
   0x1   :  { %s15_s10 = sshll.u32 %s191_s9, 4  ;;  %s167_s13 = scalar_lea.hbm %s234_s1, 256  ;;  %s16_s10 = int_to_ptr.vmem [resolvable:$true] %s15_s10 }
   0x2   :  { %p168_p0 = scmp.ne.s32.totalorder %s234_s1, %s167_s13  ;;  %p171_p1 = scmp.lt.u32.totalorder %s167_s13, %s234_s1 }
   0x4   :  { %p173_p2 = pnand %p171_p1, %p168_p0 }
   0x6   :  { %176 = shalt.err (!%p173_p2)
}
   0x7   :  { %s177_s18 = scalar_lea.vmem %s16_s10, 256  ;;  %p182_p4 = scmp.lt.s32.totalorder %s16_s10, %s16_s10 }
   0x8   :  { %p178_p3 = scmp.ne.s32.totalorder %s16_s10, %s177_s18  ;;  %p183_p5 = scmp.lt.s32.totalorder %s177_s18, %s177_s18 }
   0xa   :  { %p184_p6 = por %p183_p5, %p182_p4 }
   0xc   :  { %p185_p7 = pnand %p184_p6, %p178_p3 }
   0xe   :  { %188 = shalt.err (!%p185_p7)
}
   0xf   :  { %s192_s19 = smov 128   ;;  %s193_s20 = smov 8  }
  0x10   :  { %21 = dma.hbm_to_vmem [thread:$0]  %s234_s1, 256, %s16_s10, [#allocation3], %s192_s19, %s192_s19, %s193_s20  }
  0x11   :  { %189 = dma.done.wait [#allocation3], 256  }
  0x12   :  { %190 = vsyncadd [#allocation3], 4294967040  ;;  %v194_v0 = vmov 2   ;;  %v195_v1 = vmov 0   ;;  %vm26_vm0 = vcmask 31744   ;;  %v25_v2 = vld [vmem:[%s233_s0] sm:$0xff]  ;;  %v53_v29 = vlaneseq }
  0x13   :  { %160 = vset.pattern.permute.xlu1 %v194_v0  ;;  %158 = vset.pattern.permute.xlu0 %v195_v1  ;;  %v27_v3 = vsel %vm26_vm0, %v25_v2, 0.0  ;;  %v34_v4 = vmul.f32 %v25_v2, %v25_v2  ;;  %v196_v27 = vmov 3   ;;  %v197_v28 = vmov 1   ;;  %v51_v32 = vld [vmem:[#allocation2] sm:$0xff]  ;;  %v52_v55 = vld [vmem:[#allocation2 + $0x8] sm:$0xff] }
  0x14   :  { %v28_v5 = vrot.slane %v27_v3, 4  ;;  %v54_v30 = vshrl.u32 %v53_v29, 7  ;;  %vm144_vm1 = vcmask 23552  }
  0x15   :  { %v35_v6 = vsel %vm26_vm0, %v34_v4, 0.0 }
  0x16   :  { %v29_v7 = vadd.f32 %v28_v5, %v27_v3  ;;  %v36_v8 = vrot.slane %v35_v6, 4  ;;  %v64_v31 = vsub.s32 0, %v54_v30  ;;  %v55_v33 = vsub.s32 4, %v54_v30 }
  0x17   :  { %v83_v35 = vsub.s32 2, %v54_v30  ;;  %v93_v36 = vsub.s32 3, %v54_v30  ;;  %v74_v37 = vsub.s32 1, %v54_v30 }
  0x18   :  { %v30_v9 = vrot.slane %v29_v7, 2  ;;  %v37_v10 = vadd.f32 %v36_v8, %v35_v6  ;;  %v65_v34 = vrot.slane %v51_v32, %v64_v31  ;;  %v56_v39 = vrot.slane %v51_v32, %v55_v33 }
  0x19   :  { %v84_v42 = vrot.slane %v51_v32, %v83_v35  ;;  %v94_v43 = vrot.slane %v51_v32, %v93_v36  ;;  %v75_v44 = vrot.slane %v51_v32, %v74_v37  ;;  %v111_v56 = vrot.slane %v52_v55, %v64_v31 }
  0x1a   :  { %v31_v11 = vadd.f32 %v30_v9, %v29_v7  ;;  %v38_v12 = vrot.slane %v37_v10, 2  ;;  %v121_v59 = vrot.slane %v52_v55, %v74_v37  ;;  %v102_v60 = vrot.slane %v52_v55, %v55_v33 }
  0x1b   :  { %v140_v62 = vrot.slane %v52_v55, %v93_v36  ;;  %v130_v63 = vrot.slane %v52_v55, %v83_v35 }
  0x1c   :  { %v32_v13 = vrot.slane %v31_v11, 1  ;;  %v39_v14 = vadd.f32 %v38_v12, %v37_v10 }
  0x1e   :  { %v33_v15 = vadd.f32 %v32_v13, %v31_v11  ;;  %v40_v16 = vrot.slane %v39_v14, 1 }
  0x20   :  { %v41_v17 = vadd.f32 %v40_v16, %v39_v14  ;;  %v42_v18 = vmul.f32 0.125, %v33_v15 }
  0x22   :  { %v43_v19 = vmul.f32 0.125, %v41_v17  ;;  %v44_v20 = vmul.f32 %v42_v18, %v42_v18  ;;  %v47_v24 = vsub.f32 %v25_v2, %v42_v18 }
  0x24   :  { %v45_v21 = vsub.f32 %v43_v19, %v44_v20 }
  0x26   :  { %v46_v22 = vmax.f32 %v45_v21, 0.0 }
  0x28   :  { %v48_v23 = vadd.f32 1e-05, %v46_v22 }
  0x2a   :  { %165 = vrsqrt.f32 %v48_v23 }
  0x34   :  { %v166_v25 = vpop.eup %165 }
  0x35   :  { %v50_v26 = vmul.f32 %v166_v25, %v47_v24 }
  0x37   :  { %78 = vperm.xlu1 %160, %v50_v26   ;;  %59 = vperm.xlu0 %158, %v50_v26  }
  0x3b   :  { %161 = vset.pattern.permute.xlu1 %v196_v27  ;;  %159 = vset.pattern.permute.xlu0 %v197_v28 }
  0x3c   :  { %88 = vperm.xlu1 %161, %v50_v26   ;;  %69 = vperm.xlu0 %159, %v50_v26  }
  0x40   :  { %162 = vset.pattern.permute.xlu1 %v195_v1 }
  0xb6   :  { %v79_v38 = vpop.permute.xlu1 %78  ;;  %v60_v40 = vpop.permute.xlu0 %59 }
  0xb7   :  { %v66_v41 = vmul.f32 %v65_v34, %v60_v40  ;;  %v85_v48 = vmul.f32 %v84_v42, %v79_v38 }
  0xb9   :  { %v67_v45 = vadd.f32 %v66_v41, %v56_v39 }
  0xbb   :  { %v89_v46 = vpop.permute.xlu1 %88  ;;  %v70_v47 = vpop.permute.xlu0 %69  ;;  %v86_v51 = vadd.f32 %v85_v48, %v67_v45 }
  0xbc   :  { %v95_v49 = vmul.f32 %v94_v43, %v89_v46  ;;  %v76_v50 = vmul.f32 %v75_v44, %v70_v47 }
  0xbe   :  { %v96_v52 = vadd.f32 %v95_v49, %v76_v50 }
  0xc0   :  { %v97_v53 = vadd.f32 %v96_v52, %v86_v51 }
  0xc2   :  { %v98_v54 = vmax.f32 %v97_v53, 0.0 }
  0xc4   :  { %115 = vperm.xlu0 %159, %v98_v54   ;;  %105 = vperm.xlu1 %162, %v98_v54  }
  0xc8   :  { %164 = vset.pattern.permute.xlu0 %v196_v27  ;;  %163 = vset.pattern.permute.xlu1 %v194_v0 }
  0xc9   :  { %134 = vperm.xlu0 %164, %v98_v54   ;;  %124 = vperm.xlu1 %163, %v98_v54  }
 0x143   :  { %v116_v57 = vpop.permute.xlu0 %115  ;;  %v106_v58 = vpop.permute.xlu1 %105 }
 0x144   :  { %v112_v61 = vmul.f32 %v111_v56, %v106_v58  ;;  %v122_v3 = vmul.f32 %v121_v59, %v116_v57 }
 0x146   :  { %v113_v4 = vadd.f32 %v112_v61, %v102_v60 }
 0x148   :  { %v135_v1 = vpop.permute.xlu0 %134  ;;  %v125_v2 = vpop.permute.xlu1 %124 }
 0x149   :  { %v141_v5 = vmul.f32 %v140_v62, %v135_v1  ;;  %v131_v6 = vmul.f32 %v130_v63, %v125_v2 }
 0x14b   :  { %v142_v7 = vadd.f32 %v141_v5, %v122_v3  ;;  %v132_v8 = vadd.f32 %v131_v6, %v113_v4 }
 0x14d   :  { %v143_v0 = vadd.f32 %v142_v7, %v132_v8 }
 0x14f   :  { %145 = vst.msk [vmem:[%s235_s2] sm:$0xff] %vm144_vm1, %v143_v0 }
 0x150   :  { %150 = vsyncpa [#allocation3], 1 }

</bundles_post_ra>
